<compile_context>
chip_gen: v7x
topology: tpu7x:2x2x1
jax: 0.10.0
libtpu: 0.0.40
codegen_flags: <defaults>
</compile_context>

<pallas_src>
import jax
import jax.numpy as jnp
from jax.experimental import pallas as pl
from jax.experimental.pallas import tpu as pltpu

LATENT = 3
HIDDEN = 64
OUT = 28 * 28      # 784


def _cdiv(a, b):
    return (a + b - 1) // b


def _round_up(n, m):
    return _cdiv(n, m) * m


def _pick_tiles(batch, max_block_b):
    """Balanced batch tiling: multiple-of-8 tiles, minimal padding.

    Prefers >=4 grid steps (v7x megacore + per-core double buffering) as long
    as that keeps tiles >= 1024 rows (v5e/v6e per-step overhead stays <~15%).
    """
    b_r8 = _round_up(max(batch, 1), 8)
    n_tiles = max(_cdiv(b_r8, max_block_b), min(4, _cdiv(b_r8, 1024)), 1)
    bt = _round_up(_cdiv(b_r8, n_tiles), 8)
    n_tiles = _cdiv(b_r8, bt)
    return bt, n_tiles * bt


def decoder_kernel(x_ref, w1_ref, b1_ref, w2_ref, b2_ref, o_ref):
    x = x_ref[...]                       # (Bt, 3)  f32
    w1 = w1_ref[...]                     # (3, 64)  f32

    # First linear, K=3: three broadcast FMAs on the VPU instead of a systolic
    # pass with the contraction dim padded to 128.
    h = (x[:, 0:1] * w1[0:1, :]
         + x[:, 1:2] * w1[1:2, :]
         + x[:, 2:3] * w1[2:3, :])       # (Bt, 64) f32
    h = jnp.maximum(h + b1_ref[...], 0.0)

    # Second linear on the MXU: bf16 operands, f32 accumulation, f32 bias add.
    out = jnp.dot(h.astype(jnp.bfloat16), w2_ref[...],
                  preferred_element_type=jnp.float32)   # (Bt, 784) f32
    o_ref[...] = (out + b2_ref[...]).astype(o_ref.dtype)


def decoder_forward(x, w1, b1, w2_bf16, b2, *, max_block_b=2048,
                    out_dtype=jnp.float32):
    """x: (B, 3) f32.  w1:(3,64) f32, b1:(1,64) f32, w2_bf16:(64,784) bf16,
    b2:(1,784) f32.  Returns (B, 784) in `out_dtype`."""
    B = x.shape[0]
    bt, bp = _pick_tiles(B, max_block_b)
    if bp != B:
        x = jnp.pad(x, ((0, bp - B), (0, 0)))

    out_bytes = jnp.dtype(out_dtype).itemsize
    cost = pl.CostEstimate(
        flops=2 * bp * (LATENT * HIDDEN + HIDDEN * OUT),
        transcendentals=0,
        bytes_accessed=(bp * LATENT * 4            # x
                        + LATENT * HIDDEN * 4 + HIDDEN * 4     # w1, b1
                        + HIDDEN * OUT * 2 + OUT * 4           # w2 (bf16), b2
                        + bp * OUT * out_bytes))               # output

    out = pl.pallas_call(
        decoder_kernel,
        out_shape=jax.ShapeDtypeStruct((bp, OUT), out_dtype),
        grid_spec=pltpu.PrefetchScalarGridSpec(
            num_scalar_prefetch=0,
            grid=(bp // bt,),
            in_specs=[
                pl.BlockSpec((bt, LATENT), lambda i: (i, 0)),      # x tile
                pl.BlockSpec((LATENT, HIDDEN), lambda i: (0, 0)),  # w1 (resident)
                pl.BlockSpec((1, HIDDEN), lambda i: (0, 0)),       # b1 (resident)
                pl.BlockSpec((HIDDEN, OUT), lambda i: (0, 0)),     # w2 (resident)
                pl.BlockSpec((1, OUT), lambda i: (0, 0)),          # b2 (resident)
            ],
            out_specs=pl.BlockSpec((bt, OUT), lambda i: (i, 0)),
        ),
        compiler_params=pltpu.CompilerParams(
            dimension_semantics=("parallel",),
            vmem_limit_bytes=32 * 1024 * 1024),
        cost_estimate=cost,
    )(x, w1, b1, w2_bf16, b2)

    if bp != B:
        out = out[:B]   # drop batch-padding rows only; columns are exact
    return out


def init_params(key):
    # Deterministic init mimicking PyTorch nn.Linear defaults:
    # U(-1/sqrt(fan_in), 1/sqrt(fan_in)). Weights stored as (in, out) so the
    # kernel computes x @ W, matching PyTorch's x @ W.T + b.
    k1, k2, k3, k4 = jax.random.split(key, 4)
    bound1 = 1.0 / jnp.sqrt(jnp.float32(LATENT))
    bound2 = 1.0 / jnp.sqrt(jnp.float32(HIDDEN))
    w1 = jax.random.uniform(k1, (LATENT, HIDDEN), jnp.float32, -bound1, bound1)
    b1 = jax.random.uniform(k2, (1, HIDDEN), jnp.float32, -bound1, bound1)
    w2 = jax.random.uniform(k3, (HIDDEN, OUT), jnp.float32, -bound2, bound2)
    b2 = jax.random.uniform(k4, (1, OUT), jnp.float32, -bound2, bound2)
    return w1, b1, w2.astype(jnp.bfloat16), b2


if __name__ == "__main__":
    key = jax.random.PRNGKey(0)
    k_params, k_x = jax.random.split(key)
    w1, b1, w2_bf16, b2 = init_params(k_params)

    # Small batch of latent codes, shape (B, 3) as Linear(3, 64) implies.
    B = 8
    x = jax.random.normal(k_x, (B, LATENT), jnp.float32)

    out = decoder_forward(x, w1, b1, w2_bf16, b2)
    out = jax.block_until_ready(out)
    assert out.shape == (B, OUT)

    # Reference 1: same bf16 rounding applied, f32 math -> tight tolerance.
    w2_f32 = w2_bf16.astype(jnp.float32)
    h = jnp.maximum(x @ w1 + b1, 0.0)
    ref_bf16 = h.astype(jnp.bfloat16).astype(jnp.float32) @ w2_f32 + b2
    assert jnp.allclose(out, ref_bf16, atol=1e-4, rtol=1e-4)

    # Reference 2: pure f32 module semantics -> loose (bf16-level) tolerance.
    ref_f32 = h @ w2_f32 + b2
    assert jnp.allclose(out, ref_f32, atol=1e-2, rtol=1e-2)

    # Exercise the batch-padding path (B not a multiple of 8).
    out_pad = jax.block_until_ready(decoder_forward(x[:5], w1, b1, w2_bf16, b2))
    assert out_pad.shape == (5, OUT)
    assert jnp.allclose(out_pad, ref_bf16[:5], atol=1e-4, rtol=1e-4)

    # Optional bf16-output path (halves output HBM traffic), loose tolerance.
    out_bf16 = jax.block_until_ready(
        decoder_forward(x, w1, b1, w2_bf16, b2, out_dtype=jnp.bfloat16))
    assert out_bf16.dtype == jnp.bfloat16
    assert jnp.allclose(out_bf16.astype(jnp.float32), ref_bf16,
                        atol=2e-2, rtol=2e-2)

    print("KERNEL_OK")
</pallas_src>

<mosaic_0001>
module attributes {stable_mosaic.version = 11 : i64} {
  func.func @decoder_kernel(%arg0: i32, %arg1: memref<8x3xf32, #tpu.memory_space<vmem>>, %arg2: memref<3x64xf32, #tpu.memory_space<vmem>>, %arg3: memref<1x64xf32, #tpu.memory_space<vmem>>, %arg4: memref<64x784xbf16, #tpu.memory_space<vmem>>, %arg5: memref<1x784xf32, #tpu.memory_space<vmem>>, %arg6: memref<8x784xf32, #tpu.memory_space<vmem>>) attributes {dimension_semantics = [#tpu.dimension_semantics<parallel>], iteration_bounds = array<i64: 1>, scalar_prefetch = 0 : i64, scratch_operands = 0 : i64, tpu.core_type = #tpu.core_type<tc>, window_params = [{transform_indices = @transform_0, window_bounds = array<i64: 8, 3>}, {pipeline_mode = #tpu.pipeline_mode<synchronous>, transform_indices = @transform_1, window_bounds = array<i64: 3, 64>}, {pipeline_mode = #tpu.pipeline_mode<synchronous>, transform_indices = @transform_2, window_bounds = array<i64: 1, 64>}, {pipeline_mode = #tpu.pipeline_mode<synchronous>, transform_indices = @transform_3, window_bounds = array<i64: 64, 784>}, {pipeline_mode = #tpu.pipeline_mode<synchronous>, transform_indices = @transform_4, window_bounds = array<i64: 1, 784>}, {transform_indices = @transform_5, window_bounds = array<i64: 8, 784>}]} {
    %c0 = arith.constant 0 : index
    %c0_0 = arith.constant 0 : index
    %0 = vector.load %arg1[%c0, %c0_0] : memref<8x3xf32, #tpu.memory_space<vmem>>, vector<8x3xf32>
    %c0_1 = arith.constant 0 : index
    %c0_2 = arith.constant 0 : index
    %1 = vector.load %arg2[%c0_1, %c0_2] : memref<3x64xf32, #tpu.memory_space<vmem>>, vector<3x64xf32>
    %2 = vector.extract_strided_slice %0 {offsets = [0, 0], sizes = [8, 1], strides = [1, 1]} : vector<8x3xf32> to vector<8x1xf32>
    %3 = vector.extract_strided_slice %1 {offsets = [0, 0], sizes = [1, 64], strides = [1, 1]} : vector<3x64xf32> to vector<1x64xf32>
    %4 = vector.broadcast %2 : vector<8x1xf32> to vector<8x64xf32>
    %5 = vector.broadcast %3 : vector<1x64xf32> to vector<8x64xf32>
    %6 = arith.mulf %4, %5 : vector<8x64xf32>
    %7 = vector.extract_strided_slice %0 {offsets = [0, 1], sizes = [8, 1], strides = [1, 1]} : vector<8x3xf32> to vector<8x1xf32>
    %8 = vector.extract_strided_slice %1 {offsets = [1, 0], sizes = [1, 64], strides = [1, 1]} : vector<3x64xf32> to vector<1x64xf32>
    %9 = vector.broadcast %7 : vector<8x1xf32> to vector<8x64xf32>
    %10 = vector.broadcast %8 : vector<1x64xf32> to vector<8x64xf32>
    %11 = arith.mulf %9, %10 : vector<8x64xf32>
    %12 = arith.addf %6, %11 : vector<8x64xf32>
    %13 = vector.extract_strided_slice %0 {offsets = [0, 2], sizes = [8, 1], strides = [1, 1]} : vector<8x3xf32> to vector<8x1xf32>
    %14 = vector.extract_strided_slice %1 {offsets = [2, 0], sizes = [1, 64], strides = [1, 1]} : vector<3x64xf32> to vector<1x64xf32>
    %15 = vector.broadcast %13 : vector<8x1xf32> to vector<8x64xf32>
    %16 = vector.broadcast %14 : vector<1x64xf32> to vector<8x64xf32>
    %17 = arith.mulf %15, %16 : vector<8x64xf32>
    %18 = arith.addf %12, %17 : vector<8x64xf32>
    %c0_3 = arith.constant 0 : index
    %c0_4 = arith.constant 0 : index
    %19 = vector.load %arg3[%c0_3, %c0_4] : memref<1x64xf32, #tpu.memory_space<vmem>>, vector<1x64xf32>
    %20 = vector.broadcast %19 : vector<1x64xf32> to vector<8x64xf32>
    %21 = arith.addf %18, %20 : vector<8x64xf32>
    %cst = arith.constant 0.000000e+00 : f32
    %22 = vector.broadcast %cst : f32 to vector<8x64xf32>
    %23 = arith.maximumf %21, %22 : vector<8x64xf32>
    %24 = arith.truncf %23 : vector<8x64xf32> to vector<8x64xbf16>
    %c0_5 = arith.constant 0 : index
    %c0_6 = arith.constant 0 : index
    %25 = vector.load %arg4[%c0_5, %c0_6] : memref<64x784xbf16, #tpu.memory_space<vmem>>, vector<64x784xbf16>
    %cst_7 = arith.constant dense<0.000000e+00> : vector<8x784xf32>
    %26 = tpu.matmul %24, %25, %cst_7 {dimension_numbers = #tpu.dot_dimension_numbers<[1], [0], [0], [1], [0, 0, 1, 1], [], []>} : vector<8x64xbf16>, vector<64x784xbf16>, vector<8x784xf32> -> vector<8x784xf32>
    %c0_8 = arith.constant 0 : index
    %c0_9 = arith.constant 0 : index
    %27 = vector.load %arg5[%c0_8, %c0_9] : memref<1x784xf32, #tpu.memory_space<vmem>>, vector<1x784xf32>
    %28 = vector.broadcast %27 : vector<1x784xf32> to vector<8x784xf32>
    %29 = arith.addf %26, %28 : vector<8x784xf32>
    %c0_10 = arith.constant 0 : index
    %c0_11 = arith.constant 0 : index
    %30 = vector.load %arg6[%c0_10, %c0_11] : memref<8x784xf32, #tpu.memory_space<vmem>>, vector<8x784xf32>
    tpu.vector_store %arg6[%c0_10, %c0_11], %29 {strides = array<i32>} : memref<8x784xf32, #tpu.memory_space<vmem>>, vector<8x784xf32>,
    return
  }
  func.func @transform_0(%arg0: i32) -> (i32, i32) {
    %c0_i32 = arith.constant 0 : i32
    %c0_i32_0 = arith.constant 0 : i32
    return %arg0, %c0_i32 : i32, i32
  }
  func.func @transform_1(%arg0: i32) -> (i32, i32) {
    %c0_i32 = arith.constant 0 : i32
    %c0_i32_0 = arith.constant 0 : i32
    %c0_i32_1 = arith.constant 0 : i32
    return %c0_i32, %c0_i32_0 : i32, i32
  }
  func.func @transform_2(%arg0: i32) -> (i32, i32) {
    %c0_i32 = arith.constant 0 : i32
    %c0_i32_0 = arith.constant 0 : i32
    %c0_i32_1 = arith.constant 0 : i32
    return %c0_i32, %c0_i32_0 : i32, i32
  }
  func.func @transform_3(%arg0: i32) -> (i32, i32) {
    %c0_i32 = arith.constant 0 : i32
    %c0_i32_0 = arith.constant 0 : i32
    %c0_i32_1 = arith.constant 0 : i32
    return %c0_i32, %c0_i32_0 : i32, i32
  }
  func.func @transform_4(%arg0: i32) -> (i32, i32) {
    %c0_i32 = arith.constant 0 : i32
    %c0_i32_0 = arith.constant 0 : i32
    %c0_i32_1 = arith.constant 0 : i32
    return %c0_i32, %c0_i32_0 : i32, i32
  }
  func.func @transform_5(%arg0: i32) -> (i32, i32) {
    %c0_i32 = arith.constant 0 : i32
    %c0_i32_0 = arith.constant 0 : i32
    return %arg0, %c0_i32 : i32, i32
  }
}

</mosaic_0001>

<bundles_post_ra>
// kernel: tpu_custom_call.1
= control target key start
LH: loop header
LB: loop body
LE: loop exit
PB: predicated region body
PF: predicated region fallthrough
CT: control target
= control target key end

     0   :  { %10 = vsyncpa [#allocation3], 0  ;;  %s724_s0 = inlined_call_operand.vmem [shape: f32[8,3], index: 0, kind: input, shape index: {}]   ;;  %s725_s1 = inlined_call_operand.vmem [shape: f32[3,64], index: 1, kind: input, shape index: {}]   ;;  %s726_s2 = inlined_call_operand.vmem [shape: f32[1,64], index: 2, kind: input, shape index: {}]   ;;  %s727_s3 = inlined_call_operand.hbm [shape: bf16[64,784], index: 3, kind: input, shape index: {}]   ;;  %s728_s4 = inlined_call_operand.vmem [shape: f32[1,784], index: 4, kind: input, shape index: {}]   ;;  %s729_s5 = inlined_call_operand.hbm [shape: f32[8,784], index: 5, kind: output, shape index: {}]  }
   0x1   :  { %11 = vsyncpa [#allocation4], 0  ;;  %s632_s18 = smov [#allocation2]   ;;  %s584_s22 = scalar_lea.hbm %s727_s3, 3584 }
   0x2   :  { %s23_s19 = sshll.u32 %s632_s18, 4  ;;  %p585_p0 = scmp.ne.s32.totalorder %s727_s3, %s584_s22  ;;  %s24_s19 = int_to_ptr.vmem [resolvable:$true] %s23_s19 }
   0x3   :  { %p588_p1 = scmp.lt.u32.totalorder %s584_s22, %s727_s3 }
   0x5   :  { %p590_p2 = pnand %p588_p1, %p585_p0 }
   0x7   :  { %593 = shalt.err (!%p590_p2)
}
   0x8   :  { %s594_s27 = scalar_lea.vmem %s24_s19, 3584  ;;  %p599_p4 = scmp.lt.s32.totalorder %s24_s19, %s24_s19 }
   0x9   :  { %p595_p3 = scmp.ne.s32.totalorder %s24_s19, %s594_s27  ;;  %p600_p5 = scmp.lt.s32.totalorder %s594_s27, %s594_s27 }
   0xb   :  { %p601_p6 = por %p600_p5, %p599_p4 }
   0xd   :  { %p602_p7 = pnand %p601_p6, %p595_p3 }
   0xf   :  { %605 = shalt.err (!%p602_p7)
}
  0x10   :  { %s633_s28 = smov 448   ;;  %s634_s29 = smov 28  }
  0x11   :  { %29 = dma.hbm_to_vmem [thread:$0]  %s727_s3, 3584, %s24_s19, [#allocation3], %s633_s28, %s633_s28, %s634_s29  }
  0x12   :  { %628 = dma.done.wait [#allocation3], 3584  }
  0x13   :  { %629 = vsyncadd [#allocation3], 4294963712  ;;  %v635_v0 = vmov 0   ;;  %v636_v1 = vmov 2   ;;  %v36_v2 = vld [vmem:[%s724_s0] sm:$0xff]  ;;  %v637_v8 = vmov 1   ;;  %v43_v22 = vlaneseq }
  0x14   :  { %540 = vset.pattern.permute.xlu0 %v635_v0  ;;  %542 = vset.pattern.permute.xlu1 %v636_v1  ;;  %v544_v3 = vld [vmem:[#allocation2 + $0x4] ss:$28 sps:$4 sm:$0xff]   ;;  %v546_v4 = vld [vmem:[#allocation2 + $0xc] ss:$28 sps:$4 sm:$0xff]   ;;  %v550_v7 = vld [vmem:[#allocation2 + $0x3c] ss:$28 sps:$4 sm:$0xff]  }
  0x15   :  { %327 = vmatprep.mubr.bf16.mxu0 %v635_v0  ;;  %368 = vmatprep.mubr.bf16.mxu1 %v635_v0  ;;  %v548_v5 = vld [vmem:[#allocation2] ss:$28 sps:$4 sm:$0xff]   ;;  %v549_v6 = vld [vmem:[#allocation2 + $0x8] ss:$28 sps:$4 sm:$0xff]   ;;  %v554_v10 = vld [vmem:[#allocation2 + $0x38] ss:$28 sps:$4 sm:$0xff]  }
  0x16   :  { %40 = vperm.xlu0 %540, %v36_v2   ;;  %59 = vperm.xlu1 %542, %v36_v2   ;;  %v552_v9 = vld [vmem:[#allocation2 + $0x44] ss:$28 sps:$4 sm:$0xff]   ;;  %v556_v12 = vld [vmem:[#allocation2 + $0x74] ss:$28 sps:$4 sm:$0xff]   ;;  %v558_v13 = vld [vmem:[#allocation2 + $0x7c] ss:$28 sps:$4 sm:$0xff]  }
  0x17   :  { %295 = vmatprep.subr.bf16.mxu0 %v544_v3  ;;  %336 = vmatprep.subr.bf16.mxu1 %v546_v4  ;;  %v555_v11 = vld [vmem:[#allocation2 + $0x40] ss:$28 sps:$4 sm:$0xff]   ;;  %v560_v14 = vld [vmem:[#allocation2 + $0x70] ss:$28 sps:$4 sm:$0xff]   ;;  %v561_v15 = vld [vmem:[#allocation2 + $0x78] ss:$28 sps:$4 sm:$0xff]  }
  0x18   :  { %296 = vmatpush1.bf16.msra.mxu0 %v548_v5  ;;  %337 = vmatpush1.bf16.msra.mxu1 %v549_v6  ;;  %v562_v16 = vld [vmem:[#allocation2 + $0xac] ss:$28 sps:$4 sm:$0xff]   ;;  %v564_v17 = vld [vmem:[#allocation2 + $0xb4] ss:$28 sps:$4 sm:$0xff]   ;;  %v638_v21 = vmov 0.0   ;;  %v689_v23 = vshrl.u32 %v43_v22, 7 }
  0x19   :  { %297 = vmatprep.subr.bf16.mxu0 %v550_v7  ;;  %338 = vmatprep.subr.bf16.mxu1 %v552_v9  ;;  %v566_v18 = vld [vmem:[#allocation2 + $0xa8] ss:$28 sps:$4 sm:$0xff]   ;;  %v567_v19 = vld [vmem:[#allocation2 + $0xb0] ss:$28 sps:$4 sm:$0xff]   ;;  %v37_v27 = vld [vmem:[%s725_s1] sm:$0x7] }
  0x1a   :  { %541 = vset.pattern.permute.xlu0 %v637_v8  ;;  %v570_v20 = vld [vmem:[#allocation2 + $0x14] ss:$28 sps:$4 sm:$0xff]   ;;  %v45_v24 = vsub.s32 0, %v689_v23  ;;  %v54_v25 = vsub.s32 1, %v689_v23  ;;  %v64_v26 = vsub.s32 2, %v689_v23  ;;  %vm291_vm0 = vcmask 523264  }
  0x1b   :  { %49 = vperm.xlu0 %541, %v36_v2   ;;  %v481_v38 = vld [vmem:[%s726_s2] ss:$0 sm:$0xff]  ;;  %v568_v42 = vld [vmem:[#allocation2 + $0x10] ss:$28 sps:$4 sm:$0xff]   ;;  %v572_v46 = vld [vmem:[#allocation2 + $0x48] ss:$28 sps:$4 sm:$0xff]  }
  0x1c   :  { %298 = vmatpush1.bf16.msra.mxu0 %v554_v10  ;;  %339 = vmatpush1.bf16.msra.mxu1 %v555_v11  ;;  %v46_v29 = vrot.slane %v37_v27, %v45_v24  ;;  %v55_v30 = vrot.slane %v37_v27, %v54_v25  ;;  %v65_v31 = vrot.slane %v37_v27, %v64_v26  ;;  %v571_v43 = vld [vmem:[#allocation2 + $0x18] ss:$28 sps:$4 sm:$0xff]   ;;  %v574_v45 = vld [vmem:[#allocation2 + $0x4c] ss:$28 sps:$4 sm:$0xff]   ;;  %v578_v48 = vld [vmem:[#allocation2 + $0x84] ss:$28 sps:$4 sm:$0xff]  }
  0x1d   :  { %299 = vmatprep.subr.bf16.mxu0 %v556_v12  ;;  %340 = vmatprep.subr.bf16.mxu1 %v558_v13  ;;  %v575_v47 = vld [vmem:[#allocation2 + $0x50] ss:$28 sps:$4 sm:$0xff]   ;;  %vm639_vm1 = vmmov 0   ;;  %v576_v49 = vld [vmem:[#allocation2 + $0x80] ss:$28 sps:$4 sm:$0xff]   ;;  %v126_v55 = vsub.s32 3, %v689_v23 }
  0x1e   :  { %v579_v50 = vld [vmem:[#allocation2 + $0x88] ss:$28 sps:$4 sm:$0xff]   ;;  %v582_v51 = vld [vmem:[#allocation2 + $0xbc] ss:$28 sps:$4 sm:$0xff]   ;;  %v130_v8 = vsub.s32 4, %v689_v23  ;;  %v138_v9 = vsub.s32 6, %v689_v23 }
  0x1f   :  { %543 = vset.pattern.permute.xlu0 %v636_v1  ;;  %v580_v52 = vld [vmem:[#allocation2 + $0xb8] ss:$28 sps:$4 sm:$0xff]   ;;  %v583_v53 = vld [vmem:[#allocation2 + $0xc0] ss:$28 sps:$4 sm:$0xff]   ;;  %v134_v10 = vsub.s32 5, %v689_v23  ;;  %vm464_vm2 = vcmask 130048  }
  0x20   :  { %300 = vmatpush1.bf16.msra.mxu0 %v560_v14  ;;  %341 = vmatpush1.bf16.msra.mxu1 %v561_v15  ;;  %v110_v54 = vld [vmem:[%s728_s4] sm:$0x7f]  ;;  %s640_s4 = smov [#allocation5]  }
  0x21   :  { %301 = vmatprep.subr.bf16.mxu0 %v562_v16  ;;  %342 = vmatprep.subr.bf16.mxu1 %v564_v17  ;;  %v115_v56 = vrot.slane %v110_v54, %v45_v24  ;;  %v123_v57 = vrot.slane %v110_v54, %v64_v26  ;;  %v119_v58 = vrot.slane %v110_v54, %v54_v25  ;;  %s472_s11 = sshll.u32 %s640_s4, 4  ;;  %s473_s11 = int_to_ptr.vmem [resolvable:$true] %s472_s11 }
  0x22   :  { %v127_v59 = vrot.slane %v110_v54, %v126_v55  ;;  %v131_v11 = vrot.slane %v110_v54, %v130_v8  ;;  %v139_v12 = vrot.slane %v110_v54, %v138_v9  ;;  %v135_v13 = vrot.slane %v110_v54, %v134_v10  ;;  %s606_s12 = scalar_lea.vmem %s473_s11, 896  ;;  %p611_p9 = scmp.lt.s32.totalorder %s473_s11, %s473_s11 }
  0x23   :  { %p607_p8 = scmp.ne.s32.totalorder %s473_s11, %s606_s12  ;;  %p612_p10 = scmp.lt.s32.totalorder %s606_s12, %s606_s12 }
  0x24   :  { %302 = vmatpush1.bf16.msra.mxu0 %v566_v18  ;;  %343 = vmatpush1.bf16.msra.mxu1 %v567_v19 }
  0x25   :  { %377 = vmatprep.subr.bf16.mxu0 %v570_v20  ;;  %519 = vmatprep.subr.bf16.mxu1 %v638_v21  ;;  %p613_p11 = por %p612_p10, %p611_p9 }
  0x27   :  { %p614_p12 = pnand %p613_p11, %p607_p8 }
  0x95   :  { %v41_v28 = vpop.permute.xlu0 %40  ;;  %v60_v32 = vpop.permute.xlu1 %59 }
  0x96   :  { %v47_v34 = vmul.f32 %v46_v29, %v41_v28  ;;  %v66_v36 = vmul.f32 %v65_v31, %v60_v32 }
  0x9a   :  { %v50_v33 = vpop.permute.xlu0 %49 }
  0x9b   :  { %v56_v35 = vmul.f32 %v55_v30, %v50_v33 }
  0x9d   :  { %v57_v37 = vadd.f32 %v56_v35, %v47_v34 }
  0x9f   :  { %v67_v39 = vadd.f32 %v66_v36, %v57_v37 }
  0xa1   :  { %v75_v40 = vadd.f32 %v481_v38, %v67_v39 }
  0xa3   :  { %v76_v41 = vmax.f32 %v75_v40, 0.0 }
  0xa5   :  { %v77_v44 = vpack.c.bf16 %v76_v41, %v76_v41 }
  0xa7   :  { %510 = vmatmul.mubr.msk.bf16.vlgmr.msra.gmra.mrb[0].mxu0 %vm291_vm0, %v77_v44  ;;  %511 = vmatmul.mubr.msk.bf16.vlgmr.msra.gmra.mrb[0].mxu1 %vm291_vm0, %v77_v44 }
  0xa8   :  { %378 = vmatpush1.bf16.msra.mxu0 %v568_v42  ;;  %520 = vmatpush3.bf16.msra.mxu1 %v571_v43 }
  0xa9   :  { %379 = vmatprep.subr.bf16.mxu0 %v574_v45  ;;  %521 = vmatprep.subr.bf16.mxu1 %v638_v21 }
  0xaa   :  { %409 = vmatprep.mubr.bf16.mxu0 %v635_v0  ;;  %527 = vmatprep.mubr.msk.bf16.mxu1 %vm639_vm1, %v638_v21 }
  0xac   :  { %380 = vmatpush1.bf16.msra.mxu0 %v572_v46  ;;  %522 = vmatpush3.bf16.msra.mxu1 %v575_v47 }
  0xad   :  { %381 = vmatprep.subr.bf16.mxu0 %v578_v48  ;;  %523 = vmatprep.subr.bf16.mxu1 %v638_v21 }
  0xb0   :  { %382 = vmatpush1.bf16.msra.mxu0 %v576_v49  ;;  %524 = vmatpush3.bf16.msra.mxu1 %v579_v50 }
  0xb1   :  { %383 = vmatprep.subr.bf16.mxu0 %v582_v51  ;;  %525 = vmatprep.subr.bf16.mxu1 %v638_v21 }
  0xb4   :  { %384 = vmatpush1.bf16.msra.mxu0 %v580_v52  ;;  %526 = vmatpush3.bf16.msra.mxu1 %v583_v53 }
  0xb7   :  { %512 = vmatmul.mubr.msk.bf16.vlgmr.msra.gmra.mrb[4].mxu0 %vm291_vm0, %v77_v44  ;;  %528 = vmatmul.mubr.msk.bf16.vlgmr.msra.gmra.mrb[4].mxu1 %vm291_vm0, %v77_v44 }
 0x17a   :  { %v329_v60 = vpop.f32.mrb[0].mxu0  ;;  %v370_v61 = vpop.f32.mrb[0].mxu1 }
 0x17b   :  { %v330_v62 = vadd.f32 %v329_v60, %v115_v56  ;;  %v371_v63 = vadd.f32 %v370_v61, %v123_v57  ;;  %v331_v0 = vpop.f32.mrb[1].mxu0  ;;  %v372_v1 = vpop.f32.mrb[1].mxu1 }
 0x17c   :  { %v332_v2 = vadd.f32 %v331_v0, %v119_v58  ;;  %v373_v3 = vadd.f32 %v372_v1, %v127_v59  ;;  %v333_v4 = vpop.f32.mrb[2].mxu0  ;;  %v374_v5 = vpop.f32.mrb[2].mxu1 }
 0x17d   :  { %458 = vst [vmem:[#allocation5] sm:$0xff] %v330_v62  ;;  %460 = vst [vmem:[#allocation5 + $0x10] sm:$0xff] %v371_v63  ;;  %v334_v6 = vpop.f32.mrb[3].mxu0  ;;  %v375_v7 = vpop.f32.mrb[3].mxu1 }
 0x17e   :  { %459 = vst [vmem:[#allocation5 + $0x8] sm:$0xff] %v332_v2  ;;  %461 = vst [vmem:[#allocation5 + $0x18] sm:$0xff] %v373_v3 }
 0x18a   :  { %v411_v14 = vpop.f32.mrb[4].mxu0  ;;  %v452_v15 = vpop.f32.mrb[4].mxu1 }
 0x18b   :  { %v412_v16 = vadd.f32 %v411_v14, %v131_v11  ;;  %v453_v17 = vadd.f32 %v452_v15, %v139_v12  ;;  %v413_v18 = vpop.f32.mrb[5].mxu0  ;;  %v529_v19 = vpop.f32.mrb[5].mxu1 }
 0x18c   :  { %v414_v20 = vadd.f32 %v413_v18, %v135_v13  ;;  %v415_v21 = vpop.f32.mrb[6].mxu0  ;;  %v455_v22 = vpop.f32.mrb[6].mxu1 }
 0x18d   :  { %462 = vst [vmem:[#allocation5 + $0x20] sm:$0xff] %v412_v16  ;;  %465 = vst.msk [vmem:[#allocation5 + $0x30] sm:$0xff] %vm464_vm2, %v453_v17  ;;  %v416_v24 = vpop.f32.mrb[7].mxu0  ;;  %v530_v23 = vpop.f32.mrb[7].mxu1 }
 0x18e   :  { %463 = vst [vmem:[#allocation5 + $0x28] sm:$0xff] %v414_v20 }
 0x18f   :  { %617 = shalt.err (!%p614_p12)
}
 0x190   :  { %s618_s15 = scalar_lea.hbm %s729_s5, 896 }
 0x191   :  { %p619_p13 = scmp.ne.s32.totalorder %s729_s5, %s618_s15  ;;  %p622_p0 = scmp.lt.u32.totalorder %s618_s15, %s729_s5 }
 0x193   :  { %p624_p1 = pnand %p622_p0, %p619_p13 }
 0x195   :  { %627 = shalt.err (!%p624_p1)
}
 0x196   :  { %475 = dma.vmem_to_hbm [thread:$0]  %s473_s11, 896, %s729_s5, [#allocation4]  }
 0x197   :  { %630 = dma.done.wait [#allocation4], 896  }
 0x198   :  { %631 = vsyncadd [#allocation4], 4294966400 }
 0x199   :  { %479 = vsyncpa [#allocation3], 1 }
 0x19a   :  { %480 = vsyncpa [#allocation4], 1 }

</bundles_post_ra>
